<compile_context>
chip_gen: v5e
topology: v5e:2x2
jax: 0.10.0
libtpu: 0.0.40
codegen_flags: <defaults>
</compile_context>

<pallas_src>
import functools

import jax
import jax.numpy as jnp
from jax.experimental import pallas as pl
from jax.experimental.pallas import tpu as pltpu

BN_EPS = 1e-5

# Tile caps.  M tiles are always multiples of 128 (v5e-safe); Cout tiles cap
# at 256 (v6e/v7x MXU granule).  At production channel counts (<=1024) the
# per-block VMEM stays well under the 32 MiB scoped default on every gen.
_TM_CAP = 512
_TN_CAP = 256


def _round_up(x, m):
    return ((x + m - 1) // m) * m


def _pick_m_tile(mpad):
    """Largest 128-multiple tile <= _TM_CAP dividing mpad, preferring >=2 tiles
    so the 'parallel' M axis can shard across megacore / v7x's two TCs."""
    assert mpad % 128 == 0
    if mpad <= 128:
        return mpad
    best = 128
    t = 128
    while t <= min(_TM_CAP, mpad // 2):
        if mpad % t == 0:
            best = t
        t += 128
    return best


def _mish(y, exact_recip):
    """Mish(y) = y * tanh(softplus(y)) = y * ((1+e)^2 - 1) / ((1+e)^2 + 1).

    Uses t = e*(e+2) == (1+e)^2 - 1 (no catastrophic cancellation for y << 0)
    and a single EUP exp.  `exact_recip` uses a true divide (final f32 layer);
    otherwise the approx EUP reciprocal (free slot, < bf16 precision error).
    """
    e = jnp.exp(jnp.minimum(y, 20.0))
    t = e * (e + 2.0)
    if exact_recip:
        return y * t / (t + 2.0)
    return y * t * pl.reciprocal(t + 2.0, approx=True)


# ----------------------------------------------------------------------------
# Kernel A: multi-K-segment 1x1-style matmul  (downsample / after_csp / transition)
# ----------------------------------------------------------------------------
def _make_conv_kernel(num_segments, exact_recip):
    def kernel(*refs):
        a_refs = refs[:num_segments]
        w_refs = refs[num_segments:2 * num_segments]
        shift_ref, mask_ref, o_ref = refs[2 * num_segments:]
        acc = jnp.dot(w_refs[0][...], a_refs[0][...],
                      preferred_element_type=jnp.float32)
        for s in range(1, num_segments):
            acc = acc + jnp.dot(w_refs[s][...], a_refs[s][...],
                                preferred_element_type=jnp.float32)
        y = acc + shift_ref[...]                       # (tn, 1) broadcast on lanes
        out = _mish(y, exact_recip) * mask_ref[...]    # zero ring / tail columns
        o_ref[...] = out.astype(o_ref.dtype)
    return kernel


def _conv_mm(segments, shift, mask, *, out_dtype=jnp.bfloat16, exact_recip=False):
    """out(Cout, Mpad) = mask * Mish(sum_s W_s @ A_s + shift).

    segments : list of (a, w); a (K_s, Mpad) bf16 activations, w (Cout, K_s) bf16.
    shift    : (Cout, 1) f32  (BN beta/bias/mean folded).
    mask     : (1, Mpad) f32 interior mask of the padded-flattened layout.
    Spatial (Mpad) sits on the lane axis -> lane-dense loads and stores.
    K (= Cin per segment) is kept whole per block (<= ~512 even at DarkNet53
    production widths); M/Cout tile over a fully 'parallel' grid.
    """
    cout = segments[0][1].shape[0]
    mpad = segments[0][0].shape[1]
    tn = cout if (cout <= _TN_CAP or cout % _TN_CAP != 0) else _TN_CAP
    tm = _pick_m_tile(mpad)
    grid = (cout // tn, mpad // tm)

    in_specs, inputs = [], []
    for a, _ in segments:
        in_specs.append(pl.BlockSpec((a.shape[0], tm), lambda j, i: (0, i)))
        inputs.append(a)
    for _, w in segments:
        in_specs.append(pl.BlockSpec((tn, w.shape[1]), lambda j, i: (j, 0)))
        inputs.append(w)
    in_specs.append(pl.BlockSpec((tn, 1), lambda j, i: (j, 0)))
    inputs.append(shift)
    in_specs.append(pl.BlockSpec((1, tm), lambda j, i: (0, i)))
    inputs.append(mask)

    return pl.pallas_call(
        _make_conv_kernel(len(segments), exact_recip),
        out_shape=jax.ShapeDtypeStruct((cout, mpad), out_dtype),
        grid=grid,
        in_specs=in_specs,
        out_specs=pl.BlockSpec((tn, tm), lambda j, i: (j, i)),
        compiler_params=pltpu.CompilerParams(
            dimension_semantics=("parallel", "parallel")),
    )(*inputs)


# ----------------------------------------------------------------------------
# Kernel B: fused DarkNetBottleneck (1x1 -> 3x3 via rolled taps -> +residual)
# ----------------------------------------------------------------------------
def _make_bottleneck_kernel(offsets, mpad, exact_recip=False):
    def kernel(x_ref, w1_ref, sh1_ref, w2_ref, sh2_ref, mask_ref, o_ref):
        x = x_ref[...]                                  # (C, Mpad) bf16
        mask = mask_ref[...]                            # (1, Mpad) f32
        # conv1 (1x1): hidden activation stays in VMEM/vregs, never hits HBM.
        h = jnp.dot(w1_ref[...], x, preferred_element_type=jnp.float32)
        h = _mish(h + sh1_ref[...], exact_recip) * mask  # zero ring -> boundary taps read 0
        # conv2 (3x3) as 9 shifted-tap MXU matmuls; a stride-1 tap is a constant
        # shift of the padded-flattened axis, realised with an XLU roll.  Wrapped
        # (cross-image / tail) reads only land on ring columns, which get masked.
        acc = None
        for t, off in enumerate(offsets):
            a = h if off == 0 else pltpu.roll(h, shift=(-off) % mpad, axis=1)
            d = jnp.dot(w2_ref[t], a.astype(jnp.bfloat16),
                        preferred_element_type=jnp.float32)
            acc = d if acc is None else acc + d
        y = acc + sh2_ref[...]
        out = (_mish(y, exact_recip) + x.astype(jnp.float32)) * mask
        o_ref[...] = out.astype(o_ref.dtype)
    return kernel


def _bottleneck_block(part2, blk, mask, offsets):
    c, mpad = part2.shape
    p1, p2 = blk["conv1"], blk["conv2"]
    hidden = p1["w"].shape[0]
    return pl.pallas_call(
        _make_bottleneck_kernel(offsets, mpad),
        out_shape=jax.ShapeDtypeStruct((c, mpad), jnp.bfloat16),
        grid=(1,),
        in_specs=[
            pl.BlockSpec((c, mpad), lambda i: (0, 0)),          # part2 (residual)
            pl.BlockSpec((hidden, c), lambda i: (0, 0)),        # conv1 weight
            pl.BlockSpec((hidden, 1), lambda i: (0, 0)),        # conv1 shift
            pl.BlockSpec((9, c, hidden), lambda i: (0, 0, 0)),  # conv2 tap weights
            pl.BlockSpec((c, 1), lambda i: (0, 0)),             # conv2 shift
            pl.BlockSpec((1, mpad), lambda i: (0, 0)),          # interior mask
        ],
        out_specs=pl.BlockSpec((c, mpad), lambda i: (0, 0)),
        # Residual input re-uses the output HBM buffer.
        input_output_aliases={0: 0},
        compiler_params=pltpu.CompilerParams(dimension_semantics=("arbitrary",)),
    )(part2, p1["w"], p1["shift"], p2["w"], p2["shift"], mask)


# ----------------------------------------------------------------------------
# Parameter init (raw PyTorch-style) + one-time folding into kernel form.
# ----------------------------------------------------------------------------
def init_base_block(key, cin, cout, k):
    k1, k2, k3, k4, k5, k6 = jax.random.split(key, 6)
    fan_in = float(cin * k * k)
    return dict(
        w=jax.random.normal(k1, (cout, cin, k, k), jnp.float32) / jnp.sqrt(fan_in),
        b=0.05 * jax.random.normal(k2, (cout,), jnp.float32),
        gamma=1.0 + 0.1 * jax.random.normal(k3, (cout,), jnp.float32),
        beta=0.1 * jax.random.normal(k4, (cout,), jnp.float32),
        mean=0.1 * jax.random.normal(k5, (cout,), jnp.float32),
        var=jax.random.uniform(k6, (cout,), jnp.float32, 0.5, 1.5),
    )


def prepare_base_block(raw, taps_major=False):
    """Fold BN (eval) + conv bias into the weights / a single shift, once.

    taps_major=False -> (Cout, kh*kw*Cin)  matmul weight (1x1 / XLA-im2col'd).
    taps_major=True  -> (kh*kw, Cout, Cin) per-tap weights for the fused 3x3.
    """
    cout, cin, kh, kw = raw["w"].shape
    scale = raw["gamma"] / jnp.sqrt(raw["var"] + BN_EPS)
    shift = raw["beta"] + (raw["b"] - raw["mean"]) * scale
    w = raw["w"] * scale[:, None, None, None]          # BN scale folded (f32)
    if taps_major:
        wq = jnp.transpose(w, (2, 3, 0, 1)).reshape(kh * kw, cout, cin)
    else:
        wq = jnp.transpose(w, (0, 2, 3, 1)).reshape(cout, kh * kw * cin)
    return dict(w=wq.astype(jnp.bfloat16),
                shift=shift.reshape(cout, 1).astype(jnp.float32))


def init_csp_stage(key, in_ch, mid_ch, out_ch, expansion, num_blocks):
    keys = jax.random.split(key, 3 + 2 * num_blocks)
    block_ch = mid_ch // 2
    hidden = block_ch // expansion
    params = {
        "downsample": init_base_block(keys[0], in_ch, mid_ch, 3),
        "after_cspblock": init_base_block(keys[1], block_ch, block_ch, 1),
        "transition": init_base_block(keys[2], 2 * block_ch, out_ch, 1),
        "cspblock": [],
    }
    for i in range(num_blocks):
        params["cspblock"].append(
            {
                "conv1": init_base_block(keys[3 + 2 * i], block_ch, hidden, 1),
                "conv2": init_base_block(keys[4 + 2 * i], hidden, block_ch, 3),
            }
        )
    return params


def prepare_csp_stage(raw):
    trans = prepare_base_block(raw["transition"])
    bc = trans["w"].shape[1] // 2
    return {
        "downsample": prepare_base_block(raw["downsample"]),
        "after_cspblock": prepare_base_block(raw["after_cspblock"]),
        # transition weight split column-wise: the channel concat becomes two
        # K-segments of one matmul (no jnp.concatenate at runtime).
        "transition": {"w1": trans["w"][:, :bc], "w2": trans["w"][:, bc:],
                       "shift": trans["shift"]},
        "cspblock": [
            {"conv1": prepare_base_block(b["conv1"]),
             "conv2": prepare_base_block(b["conv2"], taps_major=True)}
            for b in raw["cspblock"]
        ],
    }


# ----------------------------------------------------------------------------
# CSPStage forward (NCHW in / NCHW out, like the PyTorch module).
# ----------------------------------------------------------------------------
def csp_stage_forward(x_nchw, params):
    B, cin, hin, win = x_nchw.shape
    xb = x_nchw.astype(jnp.bfloat16)          # bf16 before any layout movement

    # downsample geometry: 3x3 / stride 2 / pad 1
    hout = (hin + 2 - 3) // 2 + 1
    wout = (win + 2 - 3) // 2 + 1
    hp, wp = hout + 2, wout + 2               # ring for the stride-1 3x3 convs
    m = B * hp * wp
    mpad = _round_up(m, 128)

    # interior mask over the padded-flattened axis (zero ring + alignment tail)
    mask = jnp.pad(jnp.ones((B, hout, wout), jnp.float32),
                   ((0, 0), (1, 1), (1, 1))).reshape(1, m)
    if mpad != m:
        mask = jnp.pad(mask, ((0, 0), (0, mpad - m)))

    # ---- downsample: stride-2 3x3 taps gathered in XLA, one matmul kernel ----
    xp = jnp.pad(xb, ((0, 0), (0, 0), (1, 1), (1, 1)))
    taps = [xp[:, :, dy:dy + 2 * hout:2, dx:dx + 2 * wout:2]
            for dy in range(3) for dx in range(3)]
    pat = jnp.concatenate(taps, axis=1)                    # (B, 9*Cin, Hout, Wout)
    pat = jnp.pad(pat, ((0, 0), (0, 0), (1, 1), (1, 1)))   # -> padded output layout
    a_ds = jnp.transpose(pat, (1, 0, 2, 3)).reshape(9 * cin, m)
    if mpad != m:
        a_ds = jnp.pad(a_ds, ((0, 0), (0, mpad - m)))
    p = params["downsample"]
    x_ds = _conv_mm([(a_ds, p["w"])], p["shift"], mask)    # (mid_ch, Mpad) bf16

    # ---- CSP split: cheap sublane-axis row slices (no lane shuffles) ----
    split = x_ds.shape[0] // 2
    part1, part2 = x_ds[:split], x_ds[split:]

    # ---- bottleneck chain: one fused kernel per block ----
    tap_offsets = tuple((dy - 1) * wp + (dx - 1)
                        for dy in range(3) for dx in range(3))
    for blk in params["cspblock"]:
        part2 = _bottleneck_block(part2, blk, mask, tap_offsets)

    # ---- after_cspblock: 1x1 on part2 ----
    p = params["after_cspblock"]
    part2 = _conv_mm([(part2, p["w"])], p["shift"], mask)

    # ---- transition: concat(part1, part2) expressed as two K-segments ----
    p = params["transition"]
    out_p = _conv_mm([(part1, p["w1"]), (part2, p["w2"])], p["shift"], mask,
                     out_dtype=jnp.float32, exact_recip=True)  # (out_ch, Mpad) f32

    # ---- padded-flattened channel-major -> NCHW ----
    out = out_p[:, :m].reshape(-1, B, hp, wp)[:, :, 1:1 + hout, 1:1 + wout]
    return jnp.transpose(out, (1, 0, 2, 3))


if __name__ == "__main__":
    key = jax.random.PRNGKey(0)
    kx, kp = jax.random.split(key)
    # x: (B=2, C=4, H=16, W=16) NCHW, matching the PyTorch module convention.
    x = jax.random.normal(kx, (2, 4, 16, 16), jnp.float32)
    raw_params = init_csp_stage(kp, in_ch=4, mid_ch=8, out_ch=8,
                                expansion=2, num_blocks=2)
    params = prepare_csp_stage(raw_params)  # one-time weight/BN fold (outside jit)

    fwd = jax.jit(functools.partial(csp_stage_forward, params=params))
    out = fwd(x)
    jax.block_until_ready(out)
    assert out.shape == (2, 8, 8, 8), out.shape  # (B, out_channels, H/2, W/2)
    print("KERNEL_OK")
</pallas_src>

<mosaic_0001>
module attributes {stable_mosaic.version = 11 : i64} {
  func.func @kernel(%arg0: i32, %arg1: i32, %arg2: memref<36x128xbf16, #tpu.memory_space<vmem>>, %arg3: memref<8x36xbf16, #tpu.memory_space<vmem>>, %arg4: memref<8x1xf32, #tpu.memory_space<vmem>>, %arg5: memref<1x128xf32, #tpu.memory_space<vmem>>, %arg6: memref<8x128xbf16, #tpu.memory_space<vmem>>) attributes {dimension_semantics = [#tpu.dimension_semantics<parallel>, #tpu.dimension_semantics<parallel>], iteration_bounds = array<i64: 1, 2>, scalar_prefetch = 0 : i64, scratch_operands = 0 : i64, tpu.core_type = #tpu.core_type<tc>, window_params = [{transform_indices = @transform_0, window_bounds = array<i64: 36, 128>}, {transform_indices = @transform_1, window_bounds = array<i64: 8, 36>}, {transform_indices = @transform_2, window_bounds = array<i64: 8, 1>}, {transform_indices = @transform_3, window_bounds = array<i64: 1, 128>}, {transform_indices = @transform_4, window_bounds = array<i64: 8, 128>}]} {
    %c0 = arith.constant 0 : index
    %c0_0 = arith.constant 0 : index
    %0 = vector.load %arg3[%c0, %c0_0] : memref<8x36xbf16, #tpu.memory_space<vmem>>, vector<8x36xbf16>
    %c0_1 = arith.constant 0 : index
    %c0_2 = arith.constant 0 : index
    %1 = vector.load %arg2[%c0_1, %c0_2] : memref<36x128xbf16, #tpu.memory_space<vmem>>, vector<36x128xbf16>
    %cst = arith.constant dense<0.000000e+00> : vector<8x128xf32>
    %2 = tpu.matmul %0, %1, %cst {dimension_numbers = #tpu.dot_dimension_numbers<[1], [0], [0], [1], [0, 0, 1, 1], [], []>} : vector<8x36xbf16>, vector<36x128xbf16>, vector<8x128xf32> -> vector<8x128xf32>
    %c0_3 = arith.constant 0 : index
    %c0_4 = arith.constant 0 : index
    %3 = vector.load %arg4[%c0_3, %c0_4] : memref<8x1xf32, #tpu.memory_space<vmem>>, vector<8x1xf32>
    %4 = vector.broadcast %3 : vector<8x1xf32> to vector<8x128xf32>
    %5 = arith.addf %2, %4 : vector<8x128xf32>
    %cst_5 = arith.constant 2.000000e+01 : f32
    %6 = vector.broadcast %cst_5 : f32 to vector<8x128xf32>
    %7 = arith.minimumf %5, %6 : vector<8x128xf32>
    %8 = math.exp %7 : vector<8x128xf32>
    %cst_6 = arith.constant 2.000000e+00 : f32
    %9 = vector.broadcast %cst_6 : f32 to vector<8x128xf32>
    %10 = arith.addf %8, %9 : vector<8x128xf32>
    %11 = arith.mulf %8, %10 : vector<8x128xf32>
    %12 = arith.mulf %5, %11 : vector<8x128xf32>
    %cst_7 = arith.constant 2.000000e+00 : f32
    %13 = vector.broadcast %cst_7 : f32 to vector<8x128xf32>
    %14 = arith.addf %11, %13 : vector<8x128xf32>
    %15 = tpu.reciprocal %14 {approx = true} : vector<8x128xf32> -> vector<8x128xf32>
    %16 = arith.mulf %12, %15 : vector<8x128xf32>
    %c0_8 = arith.constant 0 : index
    %c0_9 = arith.constant 0 : index
    %17 = vector.load %arg5[%c0_8, %c0_9] : memref<1x128xf32, #tpu.memory_space<vmem>>, vector<1x128xf32>
    %18 = vector.broadcast %17 : vector<1x128xf32> to vector<8x128xf32>
    %19 = arith.mulf %16, %18 : vector<8x128xf32>
    %20 = arith.truncf %19 : vector<8x128xf32> to vector<8x128xbf16>
    %c0_10 = arith.constant 0 : index
    %c0_11 = arith.constant 0 : index
    %21 = vector.load %arg6[%c0_10, %c0_11] : memref<8x128xbf16, #tpu.memory_space<vmem>>, vector<8x128xbf16>
    tpu.vector_store %arg6[%c0_10, %c0_11], %20 {strides = array<i32>} : memref<8x128xbf16, #tpu.memory_space<vmem>>, vector<8x128xbf16>,
    return
  }
  func.func @transform_0(%arg0: i32, %arg1: i32) -> (i32, i32) {
    %c0_i32 = arith.constant 0 : i32
    %c0_i32_0 = arith.constant 0 : i32
    return %c0_i32, %arg1 : i32, i32
  }
  func.func @transform_1(%arg0: i32, %arg1: i32) -> (i32, i32) {
    %c0_i32 = arith.constant 0 : i32
    %c0_i32_0 = arith.constant 0 : i32
    return %arg0, %c0_i32 : i32, i32
  }
  func.func @transform_2(%arg0: i32, %arg1: i32) -> (i32, i32) {
    %c0_i32 = arith.constant 0 : i32
    %c0_i32_0 = arith.constant 0 : i32
    return %arg0, %c0_i32 : i32, i32
  }
  func.func @transform_3(%arg0: i32, %arg1: i32) -> (i32, i32) {
    %c0_i32 = arith.constant 0 : i32
    %c0_i32_0 = arith.constant 0 : i32
    return %c0_i32, %arg1 : i32, i32
  }
  func.func @transform_4(%arg0: i32, %arg1: i32) -> (i32, i32) {
    %c0_i32 = arith.constant 0 : i32
    return %arg0, %arg1 : i32, i32
  }
}

module attributes {stable_mosaic.version = 11 : i64} {
  func.func @kernel(%arg0: i32, %arg1: i32, %arg2: memref<4x128xbf16, #tpu.memory_space<vmem>>, %arg3: memref<4x4xbf16, #tpu.memory_space<vmem>>, %arg4: memref<4x1xf32, #tpu.memory_space<vmem>>, %arg5: memref<1x128xf32, #tpu.memory_space<vmem>>, %arg6: memref<4x128xbf16, #tpu.memory_space<vmem>>) attributes {dimension_semantics = [#tpu.dimension_semantics<parallel>, #tpu.dimension_semantics<parallel>], iteration_bounds = array<i64: 1, 2>, scalar_prefetch = 0 : i64, scratch_operands = 0 : i64, tpu.core_type = #tpu.core_type<tc>, window_params = [{transform_indices = @transform_0, window_bounds = array<i64: 4, 128>}, {transform_indices = @transform_1, window_bounds = array<i64: 4, 4>}, {transform_indices = @transform_2, window_bounds = array<i64: 4, 1>}, {transform_indices = @transform_3, window_bounds = array<i64: 1, 128>}, {transform_indices = @transform_4, window_bounds = array<i64: 4, 128>}]} {
    %c0 = arith.constant 0 : index
    %c0_0 = arith.constant 0 : index
    %0 = vector.load %arg3[%c0, %c0_0] : memref<4x4xbf16, #tpu.memory_space<vmem>>, vector<4x4xbf16>
    %c0_1 = arith.constant 0 : index
    %c0_2 = arith.constant 0 : index
    %1 = vector.load %arg2[%c0_1, %c0_2] : memref<4x128xbf16, #tpu.memory_space<vmem>>, vector<4x128xbf16>
    %cst = arith.constant dense<0.000000e+00> : vector<4x128xf32>
    %2 = tpu.matmul %0, %1, %cst {dimension_numbers = #tpu.dot_dimension_numbers<[1], [0], [0], [1], [0, 0, 1, 1], [], []>} : vector<4x4xbf16>, vector<4x128xbf16>, vector<4x128xf32> -> vector<4x128xf32>
    %c0_3 = arith.constant 0 : index
    %c0_4 = arith.constant 0 : index
    %3 = vector.load %arg4[%c0_3, %c0_4] : memref<4x1xf32, #tpu.memory_space<vmem>>, vector<4x1xf32>
    %4 = vector.broadcast %3 : vector<4x1xf32> to vector<4x128xf32>
    %5 = arith.addf %2, %4 : vector<4x128xf32>
    %cst_5 = arith.constant 2.000000e+01 : f32
    %6 = vector.broadcast %cst_5 : f32 to vector<4x128xf32>
    %7 = arith.minimumf %5, %6 : vector<4x128xf32>
    %8 = math.exp %7 : vector<4x128xf32>
    %cst_6 = arith.constant 2.000000e+00 : f32
    %9 = vector.broadcast %cst_6 : f32 to vector<4x128xf32>
    %10 = arith.addf %8, %9 : vector<4x128xf32>
    %11 = arith.mulf %8, %10 : vector<4x128xf32>
    %12 = arith.mulf %5, %11 : vector<4x128xf32>
    %cst_7 = arith.constant 2.000000e+00 : f32
    %13 = vector.broadcast %cst_7 : f32 to vector<4x128xf32>
    %14 = arith.addf %11, %13 : vector<4x128xf32>
    %15 = tpu.reciprocal %14 {approx = true} : vector<4x128xf32> -> vector<4x128xf32>
    %16 = arith.mulf %12, %15 : vector<4x128xf32>
    %c0_8 = arith.constant 0 : index
    %c0_9 = arith.constant 0 : index
    %17 = vector.load %arg5[%c0_8, %c0_9] : memref<1x128xf32, #tpu.memory_space<vmem>>, vector<1x128xf32>
    %18 = vector.broadcast %17 : vector<1x128xf32> to vector<4x128xf32>
    %19 = arith.mulf %16, %18 : vector<4x128xf32>
    %20 = arith.truncf %19 : vector<4x128xf32> to vector<4x128xbf16>
    %c0_10 = arith.constant 0 : index
    %c0_11 = arith.constant 0 : index
    %21 = vector.load %arg6[%c0_10, %c0_11] : memref<4x128xbf16, #tpu.memory_space<vmem>>, vector<4x128xbf16>
    tpu.vector_store %arg6[%c0_10, %c0_11], %20 {strides = array<i32>} : memref<4x128xbf16, #tpu.memory_space<vmem>>, vector<4x128xbf16>,
    return
  }
  func.func @transform_0(%arg0: i32, %arg1: i32) -> (i32, i32) {
    %c0_i32 = arith.constant 0 : i32
    %c0_i32_0 = arith.constant 0 : i32
    return %c0_i32, %arg1 : i32, i32
  }
  func.func @transform_1(%arg0: i32, %arg1: i32) -> (i32, i32) {
    %c0_i32 = arith.constant 0 : i32
    %c0_i32_0 = arith.constant 0 : i32
    return %arg0, %c0_i32 : i32, i32
  }
  func.func @transform_2(%arg0: i32, %arg1: i32) -> (i32, i32) {
    %c0_i32 = arith.constant 0 : i32
    %c0_i32_0 = arith.constant 0 : i32
    return %arg0, %c0_i32 : i32, i32
  }
  func.func @transform_3(%arg0: i32, %arg1: i32) -> (i32, i32) {
    %c0_i32 = arith.constant 0 : i32
    %c0_i32_0 = arith.constant 0 : i32
    return %c0_i32, %arg1 : i32, i32
  }
  func.func @transform_4(%arg0: i32, %arg1: i32) -> (i32, i32) {
    %c0_i32 = arith.constant 0 : i32
    return %arg0, %arg1 : i32, i32
  }
}

module attributes {stable_mosaic.version = 11 : i64} {
  func.func @kernel(%arg0: i32, %arg1: memref<4x256xbf16, #tpu.memory_space<vmem>>, %arg2: memref<2x4xbf16, #tpu.memory_space<vmem>>, %arg3: memref<2x1xf32, #tpu.memory_space<vmem>>, %arg4: memref<9x4x2xbf16, #tpu.memory_space<vmem>>, %arg5: memref<4x1xf32, #tpu.memory_space<vmem>>, %arg6: memref<1x256xf32, #tpu.memory_space<vmem>>, %arg7: memref<4x256xbf16, #tpu.memory_space<vmem>>) attributes {dimension_semantics = [#tpu.dimension_semantics<arbitrary>], iteration_bounds = array<i64: 1>, scalar_prefetch = 0 : i64, scratch_operands = 0 : i64, tpu.core_type = #tpu.core_type<tc>, window_params = [{pipeline_mode = #tpu.pipeline_mode<synchronous>, transform_indices = @transform_0, window_bounds = array<i64: 4, 256>}, {pipeline_mode = #tpu.pipeline_mode<synchronous>, transform_indices = @transform_1, window_bounds = array<i64: 2, 4>}, {pipeline_mode = #tpu.pipeline_mode<synchronous>, transform_indices = @transform_2, window_bounds = array<i64: 2, 1>}, {pipeline_mode = #tpu.pipeline_mode<synchronous>, transform_indices = @transform_3, window_bounds = array<i64: 9, 4, 2>}, {pipeline_mode = #tpu.pipeline_mode<synchronous>, transform_indices = @transform_4, window_bounds = array<i64: 4, 1>}, {pipeline_mode = #tpu.pipeline_mode<synchronous>, transform_indices = @transform_5, window_bounds = array<i64: 1, 256>}, {pipeline_mode = #tpu.pipeline_mode<synchronous>, transform_indices = @transform_6, window_bounds = array<i64: 4, 256>}]} {
    %c0 = arith.constant 0 : index
    %c0_0 = arith.constant 0 : index
    %0 = vector.load %arg1[%c0, %c0_0] : memref<4x256xbf16, #tpu.memory_space<vmem>>, vector<4x256xbf16>
    %c0_1 = arith.constant 0 : index
    %c0_2 = arith.constant 0 : index
    %1 = vector.load %arg6[%c0_1, %c0_2] : memref<1x256xf32, #tpu.memory_space<vmem>>, vector<1x256xf32>
    %c0_3 = arith.constant 0 : index
    %c0_4 = arith.constant 0 : index
    %2 = vector.load %arg2[%c0_3, %c0_4] : memref<2x4xbf16, #tpu.memory_space<vmem>>, vector<2x4xbf16>
    %cst = arith.constant dense<0.000000e+00> : vector<2x256xf32>
    %3 = tpu.matmul %2, %0, %cst {dimension_numbers = #tpu.dot_dimension_numbers<[1], [0], [0], [1], [0, 0, 1, 1], [], []>} : vector<2x4xbf16>, vector<4x256xbf16>, vector<2x256xf32> -> vector<2x256xf32>
    %c0_5 = arith.constant 0 : index
    %c0_6 = arith.constant 0 : index
    %4 = vector.load %arg3[%c0_5, %c0_6] : memref<2x1xf32, #tpu.memory_space<vmem>>, vector<2x1xf32>
    %5 = vector.broadcast %4 : vector<2x1xf32> to vector<2x256xf32>
    %6 = arith.addf %3, %5 : vector<2x256xf32>
    %cst_7 = arith.constant 2.000000e+01 : f32
    %7 = vector.broadcast %cst_7 : f32 to vector<2x256xf32>
    %8 = arith.minimumf %6, %7 : vector<2x256xf32>
    %9 = math.exp %8 : vector<2x256xf32>
    %cst_8 = arith.constant 2.000000e+00 : f32
    %10 = vector.broadcast %cst_8 : f32 to vector<2x256xf32>
    %11 = arith.addf %9, %10 : vector<2x256xf32>
    %12 = arith.mulf %9, %11 : vector<2x256xf32>
    %13 = arith.mulf %6, %12 : vector<2x256xf32>
    %cst_9 = arith.constant 2.000000e+00 : f32
    %14 = vector.broadcast %cst_9 : f32 to vector<2x256xf32>
    %15 = arith.addf %12, %14 : vector<2x256xf32>
    %16 = tpu.reciprocal %15 {approx = true} : vector<2x256xf32> -> vector<2x256xf32>
    %17 = arith.mulf %13, %16 : vector<2x256xf32>
    %18 = vector.broadcast %1 : vector<1x256xf32> to vector<2x256xf32>
    %19 = arith.mulf %17, %18 : vector<2x256xf32>
    %c11_i32 = arith.constant 11 : i32
    %20 = tpu.dynamic_rotate %19 by %c11_i32 dim 1 : vector<2x256xf32>, i32 -> vector<2x256xf32>
    %c0_10 = arith.constant 0 : index
    %c0_11 = arith.constant 0 : index
    %c0_12 = arith.constant 0 : index
    %21 = vector.load %arg4[%c0_10, %c0_11, %c0_12] : memref<9x4x2xbf16, #tpu.memory_space<vmem>>, vector<1x4x2xbf16>
    %22 = vector.shape_cast %21 : vector<1x4x2xbf16> to vector<4x2xbf16>
    %23 = arith.truncf %20 : vector<2x256xf32> to vector<2x256xbf16>
    %cst_13 = arith.constant dense<0.000000e+00> : vector<4x256xf32>
    %24 = tpu.matmul %22, %23, %cst_13 {dimension_numbers = #tpu.dot_dimension_numbers<[1], [0], [0], [1], [0, 0, 1, 1], [], []>} : vector<4x2xbf16>, vector<2x256xbf16>, vector<4x256xf32> -> vector<4x256xf32>
    %c10_i32 = arith.constant 10 : i32
    %25 = tpu.dynamic_rotate %19 by %c10_i32 dim 1 : vector<2x256xf32>, i32 -> vector<2x256xf32>
    %c1 = arith.constant 1 : index
    %c0_14 = arith.constant 0 : index
    %c0_15 = arith.constant 0 : index
    %26 = vector.load %arg4[%c1, %c0_14, %c0_15] : memref<9x4x2xbf16, #tpu.memory_space<vmem>>, vector<1x4x2xbf16>
    %27 = vector.shape_cast %26 : vector<1x4x2xbf16> to vector<4x2xbf16>
    %28 = arith.truncf %25 : vector<2x256xf32> to vector<2x256xbf16>
    %cst_16 = arith.constant dense<0.000000e+00> : vector<4x256xf32>
    %29 = tpu.matmul %27, %28, %cst_16 {dimension_numbers = #tpu.dot_dimension_numbers<[1], [0], [0], [1], [0, 0, 1, 1], [], []>} : vector<4x2xbf16>, vector<2x256xbf16>, vector<4x256xf32> -> vector<4x256xf32>
    %30 = arith.addf %24, %29 : vector<4x256xf32>
    %c9_i32 = arith.constant 9 : i32
    %31 = tpu.dynamic_rotate %19 by %c9_i32 dim 1 : vector<2x256xf32>, i32 -> vector<2x256xf32>
    %c2 = arith.constant 2 : index
    %c0_17 = arith.constant 0 : index
    %c0_18 = arith.constant 0 : index
    %32 = vector.load %arg4[%c2, %c0_17, %c0_18] : memref<9x4x2xbf16, #tpu.memory_space<vmem>>, vector<1x4x2xbf16>
    %33 = vector.shape_cast %32 : vector<1x4x2xbf16> to vector<4x2xbf16>
    %34 = arith.truncf %31 : vector<2x256xf32> to vector<2x256xbf16>
    %cst_19 = arith.constant dense<0.000000e+00> : vector<4x256xf32>
    %35 = tpu.matmul %33, %34, %cst_19 {dimension_numbers = #tpu.dot_dimension_numbers<[1], [0], [0], [1], [0, 0, 1, 1], [], []>} : vector<4x2xbf16>, vector<2x256xbf16>, vector<4x256xf32> -> vector<4x256xf32>
    %36 = arith.addf %30, %35 : vector<4x256xf32>
    %c1_i32 = arith.constant 1 : i32
    %37 = tpu.dynamic_rotate %19 by %c1_i32 dim 1 : vector<2x256xf32>, i32 -> vector<2x256xf32>
    %c3 = arith.constant 3 : index
    %c0_20 = arith.constant 0 : index
    %c0_21 = arith.constant 0 : index
    %38 = vector.load %arg4[%c3, %c0_20, %c0_21] : memref<9x4x2xbf16, #tpu.memory_space<vmem>>, vector<1x4x2xbf16>
    %39 = vector.shape_cast %38 : vector<1x4x2xbf16> to vector<4x2xbf16>
    %40 = arith.truncf %37 : vector<2x256xf32> to vector<2x256xbf16>
    %cst_22 = arith.constant dense<0.000000e+00> : vector<4x256xf32>
    %41 = tpu.matmul %39, %40, %cst_22 {dimension_numbers = #tpu.dot_dimension_numbers<[1], [0], [0], [1], [0, 0, 1, 1], [], []>} : vector<4x2xbf16>, vector<2x256xbf16>, vector<4x256xf32> -> vector<4x256xf32>
    %42 = arith.addf %36, %41 : vector<4x256xf32>
    %c4 = arith.constant 4 : index
    %c0_23 = arith.constant 0 : index
    %c0_24 = arith.constant 0 : index
    %43 = vector.load %arg4[%c4, %c0_23, %c0_24] : memref<9x4x2xbf16, #tpu.memory_space<vmem>>, vector<1x4x2xbf16>
    %44 = vector.shape_cast %43 : vector<1x4x2xbf16> to vector<4x2xbf16>
    %45 = arith.truncf %19 : vector<2x256xf32> to vector<2x256xbf16>
    %cst_25 = arith.constant dense<0.000000e+00> : vector<4x256xf32>
    %46 = tpu.matmul %44, %45, %cst_25 {dimension_numbers = #tpu.dot_dimension_numbers<[1], [0], [0], [1], [0, 0, 1, 1], [], []>} : vector<4x2xbf16>, vector<2x256xbf16>, vector<4x256xf32> -> vector<4x256xf32>
    %47 = arith.addf %42, %46 : vector<4x256xf32>
    %c255_i32 = arith.constant 255 : i32
    %48 = tpu.dynamic_rotate %19 by %c255_i32 dim 1 : vector<2x256xf32>, i32 -> vector<2x256xf32>
    %c5 = arith.constant 5 : index
    %c0_26 = arith.constant 0 : index
    %c0_27 = arith.constant 0 : index
    %49 = vector.load %arg4[%c5, %c0_26, %c0_27] : memref<9x4x2xbf16, #tpu.memory_space<vmem>>, vector<1x4x2xbf16>
    %50 = vector.shape_cast %49 : vector<1x4x2xbf16> to vector<4x2xbf16>
    %51 = arith.truncf %48 : vector<2x256xf32> to vector<2x256xbf16>
    %cst_28 = arith.constant dense<0.000000e+00> : vector<4x256xf32>
    %52 = tpu.matmul %50, %51, %cst_28 {dimension_numbers = #tpu.dot_dimension_numbers<[1], [0], [0], [1], [0, 0, 1, 1], [], []>} : vector<4x2xbf16>, vector<2x256xbf16>, vector<4x256xf32> -> vector<4x256xf32>
    %53 = arith.addf %47, %52 : vector<4x256xf32>
    %c247_i32 = arith.constant 247 : i32
    %54 = tpu.dynamic_rotate %19 by %c247_i32 dim 1 : vector<2x256xf32>, i32 -> vector<2x256xf32>
    %c6 = arith.constant 6 : index
    %c0_29 = arith.constant 0 : index
    %c0_30 = arith.constant 0 : index
    %55 = vector.load %arg4[%c6, %c0_29, %c0_30] : memref<9x4x2xbf16, #tpu.memory_space<vmem>>, vector<1x4x2xbf16>
    %56 = vector.shape_cast %55 : vector<1x4x2xbf16> to vector<4x2xbf16>
    %57 = arith.truncf %54 : vector<2x256xf32> to vector<2x256xbf16>
    %cst_31 = arith.constant dense<0.000000e+00> : vector<4x256xf32>
    %58 = tpu.matmul %56, %57, %cst_31 {dimension_numbers = #tpu.dot_dimension_numbers<[1], [0], [0], [1], [0, 0, 1, 1], [], []>} : vector<4x2xbf16>, vector<2x256xbf16>, vector<4x256xf32> -> vector<4x256xf32>
    %59 = arith.addf %53, %58 : vector<4x256xf32>
    %c246_i32 = arith.constant 246 : i32
    %60 = tpu.dynamic_rotate %19 by %c246_i32 dim 1 : vector<2x256xf32>, i32 -> vector<2x256xf32>
    %c7 = arith.constant 7 : index
    %c0_32 = arith.constant 0 : index
    %c0_33 = arith.constant 0 : index
    %61 = vector.load %arg4[%c7, %c0_32, %c0_33] : memref<9x4x2xbf16, #tpu.memory_space<vmem>>, vector<1x4x2xbf16>
    %62 = vector.shape_cast %61 : vector<1x4x2xbf16> to vector<4x2xbf16>
    %63 = arith.truncf %60 : vector<2x256xf32> to vector<2x256xbf16>
    %cst_34 = arith.constant dense<0.000000e+00> : vector<4x256xf32>
    %64 = tpu.matmul %62, %63, %cst_34 {dimension_numbers = #tpu.dot_dimension_numbers<[1], [0], [0], [1], [0, 0, 1, 1], [], []>} : vector<4x2xbf16>, vector<2x256xbf16>, vector<4x256xf32> -> vector<4x256xf32>
    %65 = arith.addf %59, %64 : vector<4x256xf32>
    %c245_i32 = arith.constant 245 : i32
    %66 = tpu.dynamic_rotate %19 by %c245_i32 dim 1 : vector<2x256xf32>, i32 -> vector<2x256xf32>
    %c8 = arith.constant 8 : index
    %c0_35 = arith.constant 0 : index
    %c0_36 = arith.constant 0 : index
    %67 = vector.load %arg4[%c8, %c0_35, %c0_36] : memref<9x4x2xbf16, #tpu.memory_space<vmem>>, vector<1x4x2xbf16>
    %68 = vector.shape_cast %67 : vector<1x4x2xbf16> to vector<4x2xbf16>
    %69 = arith.truncf %66 : vector<2x256xf32> to vector<2x256xbf16>
    %cst_37 = arith.constant dense<0.000000e+00> : vector<4x256xf32>
    %70 = tpu.matmul %68, %69, %cst_37 {dimension_numbers = #tpu.dot_dimension_numbers<[1], [0], [0], [1], [0, 0, 1, 1], [], []>} : vector<4x2xbf16>, vector<2x256xbf16>, vector<4x256xf32> -> vector<4x256xf32>
    %71 = arith.addf %65, %70 : vector<4x256xf32>
    %c0_38 = arith.constant 0 : index
    %c0_39 = arith.constant 0 : index
    %72 = vector.load %arg5[%c0_38, %c0_39] : memref<4x1xf32, #tpu.memory_space<vmem>>, vector<4x1xf32>
    %73 = vector.broadcast %72 : vector<4x1xf32> to vector<4x256xf32>
    %74 = arith.addf %71, %73 : vector<4x256xf32>
    %cst_40 = arith.constant 2.000000e+01 : f32
    %75 = vector.broadcast %cst_40 : f32 to vector<4x256xf32>
    %76 = arith.minimumf %74, %75 : vector<4x256xf32>
    %77 = math.exp %76 : vector<4x256xf32>
    %cst_41 = arith.constant 2.000000e+00 : f32
    %78 = vector.broadcast %cst_41 : f32 to vector<4x256xf32>
    %79 = arith.addf %77, %78 : vector<4x256xf32>
    %80 = arith.mulf %77, %79 : vector<4x256xf32>
    %81 = arith.mulf %74, %80 : vector<4x256xf32>
    %cst_42 = arith.constant 2.000000e+00 : f32
    %82 = vector.broadcast %cst_42 : f32 to vector<4x256xf32>
    %83 = arith.addf %80, %82 : vector<4x256xf32>
    %84 = tpu.reciprocal %83 {approx = true} : vector<4x256xf32> -> vector<4x256xf32>
    %85 = arith.mulf %81, %84 : vector<4x256xf32>
    %86 = arith.extf %0 : vector<4x256xbf16> to vector<4x256xf32>
    %87 = arith.addf %85, %86 : vector<4x256xf32>
    %88 = vector.broadcast %1 : vector<1x256xf32> to vector<4x256xf32>
    %89 = arith.mulf %87, %88 : vector<4x256xf32>
    %90 = arith.truncf %89 : vector<4x256xf32> to vector<4x256xbf16>
    %c0_43 = arith.constant 0 : index
    %c0_44 = arith.constant 0 : index
    %91 = vector.load %arg7[%c0_43, %c0_44] : memref<4x256xbf16, #tpu.memory_space<vmem>>, vector<4x256xbf16>
    tpu.vector_store %arg7[%c0_43, %c0_44], %90 {strides = array<i32>} : memref<4x256xbf16, #tpu.memory_space<vmem>>, vector<4x256xbf16>,
    return
  }
  func.func @transform_0(%arg0: i32) -> (i32, i32) {
    %c0_i32 = arith.constant 0 : i32
    %c0_i32_0 = arith.constant 0 : i32
    %c0_i32_1 = arith.constant 0 : i32
    return %c0_i32, %c0_i32_0 : i32, i32
  }
  func.func @transform_1(%arg0: i32) -> (i32, i32) {
    %c0_i32 = arith.constant 0 : i32
    %c0_i32_0 = arith.constant 0 : i32
    %c0_i32_1 = arith.constant 0 : i32
    return %c0_i32, %c0_i32_0 : i32, i32
  }
  func.func @transform_2(%arg0: i32) -> (i32, i32) {
    %c0_i32 = arith.constant 0 : i32
    %c0_i32_0 = arith.constant 0 : i32
    %c0_i32_1 = arith.constant 0 : i32
    return %c0_i32, %c0_i32_0 : i32, i32
  }
  func.func @transform_3(%arg0: i32) -> (i32, i32, i32) {
    %c0_i32 = arith.constant 0 : i32
    %c0_i32_0 = arith.constant 0 : i32
    %c0_i32_1 = arith.constant 0 : i32
    %c0_i32_2 = arith.constant 0 : i32
    return %c0_i32, %c0_i32_0, %c0_i32_1 : i32, i32, i32
  }
  func.func @transform_4(%arg0: i32) -> (i32, i32) {
    %c0_i32 = arith.constant 0 : i32
    %c0_i32_0 = arith.constant 0 : i32
    %c0_i32_1 = arith.constant 0 : i32
    return %c0_i32, %c0_i32_0 : i32, i32
  }
  func.func @transform_5(%arg0: i32) -> (i32, i32) {
    %c0_i32 = arith.constant 0 : i32
    %c0_i32_0 = arith.constant 0 : i32
    %c0_i32_1 = arith.constant 0 : i32
    return %c0_i32, %c0_i32_0 : i32, i32
  }
  func.func @transform_6(%arg0: i32) -> (i32, i32) {
    %c0_i32 = arith.constant 0 : i32
    %c0_i32_0 = arith.constant 0 : i32
    %c0_i32_1 = arith.constant 0 : i32
    return %c0_i32, %c0_i32_0 : i32, i32
  }
}

module attributes {stable_mosaic.version = 11 : i64} {
  func.func @kernel(%arg0: i32, %arg1: i32, %arg2: memref<4x128xbf16, #tpu.memory_space<vmem>>, %arg3: memref<4x128xbf16, #tpu.memory_space<vmem>>, %arg4: memref<8x4xbf16, #tpu.memory_space<vmem>>, %arg5: memref<8x4xbf16, #tpu.memory_space<vmem>>, %arg6: memref<8x1xf32, #tpu.memory_space<vmem>>, %arg7: memref<1x128xf32, #tpu.memory_space<vmem>>, %arg8: memref<8x128xf32, #tpu.memory_space<vmem>>) attributes {dimension_semantics = [#tpu.dimension_semantics<parallel>, #tpu.dimension_semantics<parallel>], iteration_bounds = array<i64: 1, 2>, scalar_prefetch = 0 : i64, scratch_operands = 0 : i64, tpu.core_type = #tpu.core_type<tc>, window_params = [{transform_indices = @transform_0, window_bounds = array<i64: 4, 128>}, {transform_indices = @transform_1, window_bounds = array<i64: 4, 128>}, {transform_indices = @transform_2, window_bounds = array<i64: 8, 4>}, {transform_indices = @transform_3, window_bounds = array<i64: 8, 4>}, {transform_indices = @transform_4, window_bounds = array<i64: 8, 1>}, {transform_indices = @transform_5, window_bounds = array<i64: 1, 128>}, {transform_indices = @transform_6, window_bounds = array<i64: 8, 128>}]} {
    %c0 = arith.constant 0 : index
    %c0_0 = arith.constant 0 : index
    %0 = vector.load %arg4[%c0, %c0_0] : memref<8x4xbf16, #tpu.memory_space<vmem>>, vector<8x4xbf16>
    %c0_1 = arith.constant 0 : index
    %c0_2 = arith.constant 0 : index
    %1 = vector.load %arg2[%c0_1, %c0_2] : memref<4x128xbf16, #tpu.memory_space<vmem>>, vector<4x128xbf16>
    %cst = arith.constant dense<0.000000e+00> : vector<8x128xf32>
    %2 = tpu.matmul %0, %1, %cst {dimension_numbers = #tpu.dot_dimension_numbers<[1], [0], [0], [1], [0, 0, 1, 1], [], []>} : vector<8x4xbf16>, vector<4x128xbf16>, vector<8x128xf32> -> vector<8x128xf32>
    %c0_3 = arith.constant 0 : index
    %c0_4 = arith.constant 0 : index
    %3 = vector.load %arg5[%c0_3, %c0_4] : memref<8x4xbf16, #tpu.memory_space<vmem>>, vector<8x4xbf16>
    %c0_5 = arith.constant 0 : index
    %c0_6 = arith.constant 0 : index
    %4 = vector.load %arg3[%c0_5, %c0_6] : memref<4x128xbf16, #tpu.memory_space<vmem>>, vector<4x128xbf16>
    %cst_7 = arith.constant dense<0.000000e+00> : vector<8x128xf32>
    %5 = tpu.matmul %3, %4, %cst_7 {dimension_numbers = #tpu.dot_dimension_numbers<[1], [0], [0], [1], [0, 0, 1, 1], [], []>} : vector<8x4xbf16>, vector<4x128xbf16>, vector<8x128xf32> -> vector<8x128xf32>
    %6 = arith.addf %2, %5 : vector<8x128xf32>
    %c0_8 = arith.constant 0 : index
    %c0_9 = arith.constant 0 : index
    %7 = vector.load %arg6[%c0_8, %c0_9] : memref<8x1xf32, #tpu.memory_space<vmem>>, vector<8x1xf32>
    %8 = vector.broadcast %7 : vector<8x1xf32> to vector<8x128xf32>
    %9 = arith.addf %6, %8 : vector<8x128xf32>
    %cst_10 = arith.constant 2.000000e+01 : f32
    %10 = vector.broadcast %cst_10 : f32 to vector<8x128xf32>
    %11 = arith.minimumf %9, %10 : vector<8x128xf32>
    %12 = math.exp %11 : vector<8x128xf32>
    %cst_11 = arith.constant 2.000000e+00 : f32
    %13 = vector.broadcast %cst_11 : f32 to vector<8x128xf32>
    %14 = arith.addf %12, %13 : vector<8x128xf32>
    %15 = arith.mulf %12, %14 : vector<8x128xf32>
    %16 = arith.mulf %9, %15 : vector<8x128xf32>
    %cst_12 = arith.constant 2.000000e+00 : f32
    %17 = vector.broadcast %cst_12 : f32 to vector<8x128xf32>
    %18 = arith.addf %15, %17 : vector<8x128xf32>
    %19 = arith.divf %16, %18 : vector<8x128xf32>
    %c0_13 = arith.constant 0 : index
    %c0_14 = arith.constant 0 : index
    %20 = vector.load %arg7[%c0_13, %c0_14] : memref<1x128xf32, #tpu.memory_space<vmem>>, vector<1x128xf32>
    %21 = vector.broadcast %20 : vector<1x128xf32> to vector<8x128xf32>
    %22 = arith.mulf %19, %21 : vector<8x128xf32>
    %c0_15 = arith.constant 0 : index
    %c0_16 = arith.constant 0 : index
    %23 = vector.load %arg8[%c0_15, %c0_16] : memref<8x128xf32, #tpu.memory_space<vmem>>, vector<8x128xf32>
    tpu.vector_store %arg8[%c0_15, %c0_16], %22 {strides = array<i32>} : memref<8x128xf32, #tpu.memory_space<vmem>>, vector<8x128xf32>,
    return
  }
  func.func @transform_0(%arg0: i32, %arg1: i32) -> (i32, i32) {
    %c0_i32 = arith.constant 0 : i32
    %c0_i32_0 = arith.constant 0 : i32
    return %c0_i32, %arg1 : i32, i32
  }
  func.func @transform_1(%arg0: i32, %arg1: i32) -> (i32, i32) {
    %c0_i32 = arith.constant 0 : i32
    %c0_i32_0 = arith.constant 0 : i32
    return %c0_i32, %arg1 : i32, i32
  }
  func.func @transform_2(%arg0: i32, %arg1: i32) -> (i32, i32) {
    %c0_i32 = arith.constant 0 : i32
    %c0_i32_0 = arith.constant 0 : i32
    return %arg0, %c0_i32 : i32, i32
  }
  func.func @transform_3(%arg0: i32, %arg1: i32) -> (i32, i32) {
    %c0_i32 = arith.constant 0 : i32
    %c0_i32_0 = arith.constant 0 : i32
    return %arg0, %c0_i32 : i32, i32
  }
  func.func @transform_4(%arg0: i32, %arg1: i32) -> (i32, i32) {
    %c0_i32 = arith.constant 0 : i32
    %c0_i32_0 = arith.constant 0 : i32
    return %arg0, %c0_i32 : i32, i32
  }
  func.func @transform_5(%arg0: i32, %arg1: i32) -> (i32, i32) {
    %c0_i32 = arith.constant 0 : i32
    %c0_i32_0 = arith.constant 0 : i32
    return %c0_i32, %arg1 : i32, i32
  }
  func.func @transform_6(%arg0: i32, %arg1: i32) -> (i32, i32) {
    %c0_i32 = arith.constant 0 : i32
    return %arg0, %arg1 : i32, i32
  }
}

</mosaic_0001>

<bundles_post_ra>
// kernel: csp_stage_forward.5
= control target key start
LH: loop header
LB: loop body
LE: loop exit
PB: predicated region body
PF: predicated region fallthrough
CT: control target
= control target key end

     0   :  { %s650_s15 = smov 0   ;;  %s652_s16 = smov 0   ;;  %s729_s0 = inlined_call_operand.vmem [shape: bf16[36,256], index: 0, kind: input, shape index: {}]   ;;  %s730_s1 = inlined_call_operand.vmem [shape: bf16[8,36], index: 1, kind: input, shape index: {}]   ;;  %s731_s2 = inlined_call_operand.vmem [shape: f32[8,1], index: 2, kind: input, shape index: {}]   ;;  %s732_s3 = inlined_call_operand.vmem [shape: f32[1,256], index: 3, kind: input, shape index: {}]   ;;  %s733_s4 = inlined_call_operand.vmem [shape: bf16[8,256], index: 4, kind: output, shape index: {}]  }
   0x1   :  { %s654_s17 = smov 0   ;;  %s656_s18 = smov 0  }
   0x2   :  { %s658_s19 = smov 0  }
   0x3 LB: > { %s23_s20 = sadd.s32 1, %s618_s18  ;;  %p40_p1 = scmp.ne.s32.totalorder %s610_s16, %s606_s15  ;;  %s622_s19 = sphi %s658_s19, %s14_s19   ;;  %s618_s18 = sphi %s656_s18, %s737_s18   ;;  %s614_s17 = sphi %s654_s17, %s736_s17   ;;  %s610_s16 = sphi %s652_s16, %s735_s16   ;;  %s606_s15 = sphi %s650_s15, %s734_s15  }
   0x4   : > { %p24_p0 = scmp.ge.s32.totalorder %s23_s20, 2  ;;  %p41_p2 = scmp.eq.s32.totalorder %s622_s19, 0 }
   0x5   : > { %s33_s22 = sadd.s32 1, %s610_s16  ;;  %p518_p5 = scmp.ge.s32.totalorder %s622_s19, 2 }
   0x6   : > { %s739_s20 = smov (%p24_p0, %s23_s20), 0  ;;  %p42_p3 = por %p41_p2, %p40_p1 }
   0x7   : > { %s30_s21 = ssub.s32 %s618_s18, %s739_s20  ;;  %186 = sbr.rel (%p518_p5) target bundleno = 22 (0x16), region = 24 }
   0x8   : > { %p31_p4 = scmp.eq.s32.totalorder %s30_s21, 0 }
   0xa   : > { %s685_s23 = scalar_select %p31_p4, %s610_s16, %s33_s22  }
   0xc   : > { %189 = sbr.rel (!%p42_p3) target bundleno = 22 (0x16), region = 28  ;;  %s191_s24 = sand.u32 (%p42_p3), 1, %s610_s16  }
   0xd   : > { %s519_s25 = sshll.u32 (%p42_p3), %s618_s18, 2  ;;  %s535_s26 = smul.u32 (%p42_p3), 20, %s191_s24 }
   0xe   : > { %s195_s29 = scalar_lea.vmem (%p42_p3), %s729_s0, %s519_s25 }
   0xf   : > { %v212_v0 = vld [vmem:[%s195_s29] sm:$0xf] (%p42_p3)  ;;  %v214_v1 = vld [vmem:[%s195_s29 + $0x8] sm:$0xf] (%p42_p3)  ;;  %v216_v2 = vld [vmem:[%s195_s29 + $0x10] sm:$0xf] (%p42_p3) }
  0x10   : > { %s193_s30 = scalar_lea.vmem (%p42_p3), [#allocation2], %s535_s26  ;;  %v218_v3 = vld [vmem:[%s195_s29 + $0x18] sm:$0xf] (%p42_p3)  ;;  %v220_v4 = vld [vmem:[%s195_s29 + $0x20] sm:$0xf] (%p42_p3) }
  0x11   : > { %213 = vst [vmem:[%s193_s30] sm:$0xf] %v212_v0 }
  0x12   : > { %215 = vst [vmem:[%s193_s30 + $0x4] sm:$0xf] %v214_v1 }
  0x13   : > { %217 = vst [vmem:[%s193_s30 + $0x8] sm:$0xf] %v216_v2 }
  0x14   : > { %219 = vst [vmem:[%s193_s30 + $0xc] sm:$0xf] %v218_v3 }
  0x15   : > { %221 = vst [vmem:[%s193_s30 + $0x10] sm:$0xf] %v220_v4 }
  0x16 PF: > { %p520_p6 = scmp.ge.s32.totalorder %s622_s19, 1  ;;  %p260_p7 = scmp.lt.s32.totalorder %s622_s19, 3 }
  0x18   : > { %p261_p8 = pnand %p520_p6, %p260_p7 }
  0x19   : > { %s267_s5 = sand.u32 (!%p261_p8), 1, %s606_s15   ;;  %p314_p9 = scmp.lt.s32.totalorder (!%p261_p8), %s614_s17, 1 }
  0x1a   : > { %264 = sbr.rel (%p261_p8) target bundleno = 208 (0xd0), region = 73 }
  0x1b   : > { %s536_s6 = smul.u32 (!%p261_p8), 20, %s267_s5 }
  0x1d   : > { %s269_s9 = scalar_lea.vmem (!%p261_p8), [#allocation2], %s536_s6 }
  0x1f   : > { %v624_v5 = vmov 0   ;;  %v332_v6 = vld [vmem:[%s731_s2] sm:$0xff]  ;;  %s741_s17 = smov (!%p314_p9, %s614_s17), 1  ;;  %vm357_vm0 = vcmask 1041408   ;;  %vm353_vm1 = vcmask 293888  }
  0x20   : > { %578 = vset.pattern.permute.xlu0 %v624_v5  ;;  %v331_v7 = vld [vmem:[%s269_s9 + $0x10] sm:$0x3]  ;;  %s316_s12 = scalar_lea.vmem %s732_s3, %s741_s17  ;;  %v534_v11 = vld [vmem:[%s269_s9 + $0x8] sm:$0xff]  ;;  %v533_v12 = vld [vmem:[%s269_s9] sm:$0xff]  ;;  %s521_s15 = sshll.u32 %s741_s17, 2 }
  0x21   : > { %335 = vperm.xlu0 %578, %v332_v6   ;;  %v347_v8 = vunpack.c.l.b16 %v331_v7  ;;  %v326_v13 = vld [vmem:[%s730_s1] sm:$0xf]  ;;  %s324_s24 = scalar_lea.vmem %s733_s4, %s521_s15 }
  0x22   : > { %v579_v25 = vld [vmem:[%s316_s12] ss:$0 sm:$0xff] }
  0x23   : > { %v350_v9 = vpack.c.b16 %v347_v8, %v347_v8 }
  0x25   : > { %v359_v10 = vsel %vm357_vm0, %v350_v9, 0 }
  0x26   : > { %366 = vmatpush.bf16.msra.mxu0 %v359_v10 }
  0x2a   : > { %367 = vmatpush.bf16.msra.mxu0 %v534_v11 }
  0x2e   : > { %368 = vmatpush.bf16.msra.mxu0 %v533_v12 }
  0x31   : > { %530 = vmatmul.msk.bf16.vlgmr.msra.gmra.mxu0 %vm353_vm1, %v326_v13 }
  0x93   : > { %v336_v14 = vpop.permute.xlu0 %335 }
  0xae   : > { %v370_v15 = vpop.f32.mrf.mxu0 }
  0xaf   : > { %v371_v16 = vadd.f32 %v370_v15, %v336_v14 }
  0xb1   : > { %v374_v17 = vmin.f32 %v371_v16, 20.0 }
  0xb3   : > { %v375_v18 = vmul.f32 1.442695, %v374_v17 }
  0xb5   : > { %580 = vpow2.f32 %v375_v18 }
  0xb6   : > { %v372_v19 = vpop.f32.mrf.mxu0 }
  0xbb   : > { %v581_v20 = vpop.eup %580 }
  0xbc   : > { %v377_v21 = vadd.f32 2.0, %v581_v20 }
  0xbe   : > { %v378_v22 = vmul.f32 %v581_v20, %v377_v21 }
  0xc0   : > { %v380_v23 = vadd.f32 2.0, %v378_v22  ;;  %v379_v24 = vmul.f32 %v378_v22, %v371_v16 }
  0xc2   : > { %582 = vrcp.f32 %v380_v23 }
  0xc8   : > { %v583_v26 = vpop.eup %582 }
  0xc9   : > { %v382_v27 = vmul.f32 %v583_v26, %v379_v24 }
  0xcb   : > { %v387_v28 = vmul.f32 %v579_v25, %v382_v27 }
  0xcd   : > { %v388_v29 = vpack.c.bf16 %v387_v28, %v387_v28 }
  0xcf   : > { %389 = vst [vmem:[%s324_s24] sm:$0xf] %v388_v29 }
  0xd0 PF: > { %s14_s19 = sadd.s32 1, %s622_s19   ;;  %s734_s15 = smov %s610_s16 }
  0xd1   : > { %p11_p10 = scmp.ge.s32.totalorder %s14_s19, 4   ;;  %s735_s16 = smov %s685_s23 }
  0xd2   : > { %s736_s17 = smov %s618_s18  ;;  %s737_s18 = smov %s739_s20 }
  0xd3   :  { %13 = sbr.rel (!%p11_p10) target bundleno = 3 (0x3), region = 121 }

// kernel: csp_stage_forward.8
= control target key start
LH: loop header
LB: loop body
LE: loop exit
PB: predicated region body
PF: predicated region fallthrough
CT: control target
= control target key end

     0   :  { %s519_s15 = smov 0   ;;  %s521_s16 = smov 0   ;;  %s565_s0 = inlined_call_operand.vmem [shape: bf16[4,256], index: 0, kind: input, shape index: {}]   ;;  %s566_s1 = inlined_call_operand.vmem [shape: bf16[4,4], index: 1, kind: input, shape index: {}]   ;;  %s567_s2 = inlined_call_operand.vmem [shape: f32[4,1], index: 2, kind: input, shape index: {}]   ;;  %s568_s3 = inlined_call_operand.vmem [shape: f32[1,256], index: 3, kind: input, shape index: {}]   ;;  %s569_s4 = inlined_call_operand.vmem [shape: bf16[4,256], index: 4, kind: output, shape index: {}]  }
   0x1   :  { %s523_s17 = smov 0  }
   0x2 LB: > { %s23_s18 = sadd.s32 1, %s487_s16  ;;  %p432_p0 = scmp.ge.s32.totalorder %s491_s17, 1  ;;  %s491_s17 = sphi %s523_s17, %s14_s17   ;;  %s487_s16 = sphi %s521_s16, %s571_s16   ;;  %s483_s15 = sphi %s519_s15, %s570_s15  }
   0x3   : > { %p24_p1 = scmp.ge.s32.totalorder %s23_s18, 2  ;;  %p201_p2 = scmp.lt.s32.totalorder %s491_s17, 3 }
   0x5   : > { %s573_s18 = smov (%p24_p1, %s23_s18), 0  ;;  %p202_p3 = pnand %p432_p0, %p201_p2 }
   0x6   : > { %p240_p4 = scmp.lt.s32.totalorder (!%p202_p3), %s483_s15, 1 }
   0x7   : > { %205 = sbr.rel (%p202_p3) target bundleno = 179 (0xb3), region = 36 }
   0xc   : > { %v493_v0 = vmov 0   ;;  %v266_v1 = vld [vmem:[%s567_s2] sm:$0xf]  ;;  %s575_s15 = smov (!%p240_p4, %s483_s15), 1  ;;  %vm276_vm0 = vcmask 1041408   ;;  %vm272_vm1 = vcmask 31744  }
   0xd   : > { %463 = vset.pattern.permute.xlu0 %v493_v0  ;;  %s433_s21 = sshll.u32 %s575_s15, 1  ;;  %s254_s24 = scalar_lea.vmem %s568_s3, %s575_s15  ;;  %v264_v4 = vld [vmem:[%s566_s1] sm:$0x3] }
   0xe   : > { %269 = vperm.xlu0 %463, %v266_v1   ;;  %s243_s27 = scalar_lea.vmem %s565_s0, %s433_s21  ;;  %v464_v15 = vld [vmem:[%s254_s24] ss:$0 sm:$0xff]  ;;  %s262_s6 = scalar_lea.vmem %s569_s4, %s433_s21 }
   0xf   : > { %v265_v2 = vld [vmem:[%s243_s27] sm:$0x3] }
  0x10   : > { %v278_v3 = vsel %vm276_vm0, %v265_v2, 0 }
  0x11   : > { %287 = vmatpush.bf16.msra.mxu0 %v278_v3 }
  0x14   : > { %435 = vmatmul.msk.bf16.vlgmr.msra.gmra.mxu0 %vm272_vm1, %v264_v4 }
  0x80   : > { %v270_v5 = vpop.permute.xlu0 %269 }
  0x91   : > { %v289_v6 = vpop.f32.mrf.mxu0 }
  0x92   : > { %v290_v7 = vadd.f32 %v289_v6, %v270_v5 }
  0x94   : > { %v293_v8 = vmin.f32 %v290_v7, 20.0 }
  0x96   : > { %v294_v9 = vmul.f32 1.442695, %v293_v8 }
  0x98   : > { %465 = vpow2.f32 %v294_v9 }
  0x99   : > { %v291_v10 = vpop.f32.mrf.mxu0 }
  0x9e   : > { %v466_v11 = vpop.eup %465 }
  0x9f   : > { %v296_v12 = vadd.f32 2.0, %v466_v11 }
  0xa1   : > { %v297_v13 = vmul.f32 %v466_v11, %v296_v12 }
  0xa3   : > { %v299_v14 = vadd.f32 2.0, %v297_v13  ;;  %v298_v16 = vmul.f32 %v297_v13, %v290_v7 }
  0xa5   : > { %467 = vrcp.f32 %v299_v14 }
  0xab   : > { %v468_v17 = vpop.eup %467 }
  0xac   : > { %v301_v18 = vmul.f32 %v468_v17, %v298_v16 }
  0xae   : > { %v306_v19 = vmul.f32 %v464_v15, %v301_v18 }
  0xb0   : > { %v307_v20 = vpack.c.bf16 %v306_v19, %v306_v19 }
  0xb2   : > { %308 = vst [vmem:[%s262_s6] sm:$0x3] %v307_v20 }
  0xb3 PF: > { %s14_s17 = sadd.s32 1, %s491_s17   ;;  %s570_s15 = smov %s487_s16 }
  0xb4   : > { %p11_p5 = scmp.ge.s32.totalorder %s14_s17, 4   ;;  %s571_s16 = smov %s573_s18 }
  0xb6   :  { %13 = sbr.rel (!%p11_p5) target bundleno = 2 (0x2), region = 75 }

// kernel: csp_stage_forward.9
= control target key start
LH: loop header
LB: loop body
LE: loop exit
PB: predicated region body
PF: predicated region fallthrough
CT: control target
= control target key end

     0   :  { %s681_s21 = smov 0   ;;  %s683_s22 = smov 0   ;;  %s739_s0 = inlined_call_operand.vmem [shape: bf16[4,256], index: 0, kind: input, shape index: {}]   ;;  %s740_s1 = inlined_call_operand.vmem [shape: bf16[4,256], index: 1, kind: input, shape index: {}]   ;;  %s741_s2 = inlined_call_operand.vmem [shape: bf16[8,4], index: 2, kind: input, shape index: {}]   ;;  %s742_s3 = inlined_call_operand.vmem [shape: bf16[8,4], index: 3, kind: input, shape index: {}]   ;;  %s743_s4 = inlined_call_operand.vmem [shape: f32[8,1], index: 4, kind: input, shape index: {}]   ;;  %s744_s5 = inlined_call_operand.vmem [shape: f32[1,256], index: 5, kind: input, shape index: {}]   ;;  %s745_s6 = inlined_call_operand.vmem [shape: f32[8,256], index: 6, kind: output, shape index: {}]  }
   0x1   :  { %s685_s23 = smov 0  }
   0x2 LB: > { %s25_s24 = sadd.s32 1, %s639_s22  ;;  %p582_p0 = scmp.ge.s32.totalorder %s643_s23, 1  ;;  %s643_s23 = sphi %s685_s23, %s16_s23   ;;  %s639_s22 = sphi %s683_s22, %s747_s22   ;;  %s635_s21 = sphi %s681_s21, %s746_s21  }
   0x3   : > { %p26_p1 = scmp.ge.s32.totalorder %s25_s24, 2  ;;  %p269_p2 = scmp.lt.s32.totalorder %s643_s23, 3 }
   0x5   : > { %s749_s24 = smov (%p26_p1, %s25_s24), 0  ;;  %p270_p3 = pnand %p582_p0, %p269_p2 }
   0x6   : > { %p320_p4 = scmp.lt.s32.totalorder (!%p270_p3), %s635_s21, 1 }
   0x7   : > { %273 = sbr.rel (%p270_p3) target bundleno = 190 (0xbe), region = 44 }
   0xc   : > { %v645_v0 = vmov 0   ;;  %v396_v1 = vld [vmem:[%s743_s4] sm:$0xff]  ;;  %s751_s21 = smov (!%p320_p4, %s635_s21), 1  ;;  %vm360_vm0 = vcmask 1041408   ;;  %vm356_vm1 = vcmask 31744  }
   0xd   : > { %615 = vset.pattern.permute.xlu0 %v645_v0  ;;  %s583_s27 = sshll.u32 %s751_s21, 1  ;;  %v354_v6 = vld [vmem:[%s742_s3] sm:$0xf]  ;;  %s342_s16 = scalar_lea.vmem %s744_s5, %s751_s21 }
   0xe   : > { %399 = vperm.xlu0 %615, %v396_v1   ;;  %s327_s30 = scalar_lea.vmem %s740_s1, %s583_s27  ;;  %s323_s9 = scalar_lea.vmem %s739_s0, %s583_s27  ;;  %v352_v7 = vld [vmem:[%s741_s2] sm:$0xf] }
   0xf   : > { %v355_v2 = vld [vmem:[%s327_s30] sm:$0x3]  ;;  %s585_s17 = sshll.u32 %s751_s21, 3 }
  0x10   : > { %v353_v3 = vld [vmem:[%s323_s9] sm:$0x3]  ;;  %v362_v4 = vsel %vm360_vm0, %v355_v2, 0  ;;  %s350_s26 = scalar_lea.vmem %s745_s6, %s585_s17 }
  0x11   : > { %v381_v5 = vsel %vm360_vm0, %v353_v3, 0  ;;  %371 = vmatpush.bf16.msra.mxu0 %v362_v4  ;;  %v616_v31 = vld [vmem:[%s342_s16] ss:$0 sm:$0xff] }
  0x12   : > { %390 = vmatpush.bf16.msra.mxu1 %v381_v5 }
  0x14   : > { %586 = vmatmul.msk.bf16.vlgmr.msra.gmra.mxu0 %vm356_vm1, %v354_v6 }
  0x15   : > { %587 = vmatmul.msk.bf16.vlgmr.msra.gmra.mxu1 %vm356_vm1, %v352_v7 }
  0x80   : > { %v400_v8 = vpop.permute.xlu0 %399 }
  0x91   : > { %v373_v9 = vpop.f32.mrf.mxu0 }
  0x92   : > { %v392_v10 = vpop.f32.mrf.mxu1 }
  0x93   : > { %v393_v11 = vadd.f32 %v392_v10, %v373_v9 }
  0x95   : > { %v402_v12 = vadd.f32 %v400_v8, %v393_v11 }
  0x97   : > { %v403_v13 = vmin.f32 %v402_v12, 20.0 }
  0x99   : > { %v404_v14 = vmul.f32 1.442695, %v403_v13  ;;  %v375_v15 = vpop.f32.mrf.mxu0 }
  0x9a   : > { %v394_v16 = vpop.f32.mrf.mxu1 }
  0x9b   : > { %617 = vpow2.f32 %v404_v14 }
  0xa1   : > { %v618_v17 = vpop.eup %617 }
  0xa2   : > { %v406_v18 = vadd.f32 2.0, %v618_v17 }
  0xa4   : > { %v407_v19 = vmul.f32 %v618_v17, %v406_v18 }
  0xa6   : > { %v409_v20 = vadd.f32 2.0, %v407_v19  ;;  %v408_v29 = vmul.f32 %v407_v19, %v402_v12 }
  0xa8   : > { %619 = vrcp.f32 %v409_v20  ;;  %v421_v24 = vand.u32 2147483648, %v409_v20  ;;  %v419_v26 = vand.u32 2147483647, %v409_v20  ;;  %vm415_vm3 = vweird.f32 %v409_v20 }
  0xaa   : > { %v422_v28 = vor.u32 1.1754944e-38, %v421_v24  ;;  %vm420_vm5 = vcmp.eq.f32.partialorder %v419_v26, 8.507059e+37 }
  0xae   : > { %v620_v21 = vpop.eup %619 }
  0xaf   : > { %v411_v22 = vmul.f32 %v620_v21, %v409_v20  ;;  %vm416_vm2 = vweird.f32 %v620_v21 }
  0xb0   : > { %vm417_vm4 = vmor %vm415_vm3, %vm416_vm2 }
  0xb1   : > { %v412_v23 = vsub.f32 1.0, %v411_v22 }
  0xb3   : > { %v413_v25 = vmul.f32 %v620_v21, %v412_v23 }
  0xb5   : > { %v414_v27 = vadd.f32 %v620_v21, %v413_v25 }
  0xb7   : > { %v418_v30 = vsel %vm417_vm4, %v620_v21, %v414_v27 }
  0xb8   : > { %v423_v32 = vsel %vm420_vm5, %v422_v28, %v418_v30 }
  0xb9   : > { %v424_v33 = vmul.f32 %v423_v32, %v408_v29 }
  0xbb   : > { %v429_v34 = vmul.f32 %v616_v31, %v424_v33 }
  0xbd   : > { %430 = vst [vmem:[%s350_s26] sm:$0xff] %v429_v34 }
  0xbe PF: > { %s16_s23 = sadd.s32 1, %s643_s23   ;;  %s746_s21 = smov %s639_s22 }
  0xbf   : > { %p13_p5 = scmp.ge.s32.totalorder %s16_s23, 4   ;;  %s747_s22 = smov %s749_s24 }
  0xc1   :  { %15 = sbr.rel (!%p13_p5) target bundleno = 2 (0x2), region = 89 }

// kernel: csp_stage_forward.6
= control target key start
LH: loop header
LB: loop body
LE: loop exit
PB: predicated region body
PF: predicated region fallthrough
CT: control target
= control target key end

     0   :  { %v664_v1 = vmov 0   ;;  %vm41_vm0 = vcmask 1041408   ;;  %vm37_vm1 = vcmask 31744   ;;  %s666_s26 = smov 9   ;;  %s667_s27 = smov 10   ;;  %v101_v41 = vlaneseq  ;;  %s836_s0 = inlined_call_operand.vmem [shape: bf16[4,256], index: 0, kind: input, shape index: {}, may-alias: {0,6}]   ;;  %s837_s2 = inlined_call_operand.vmem [shape: f32[2,1], index: 2, kind: input, shape index: {}]   ;;  %s838_s1 = inlined_call_operand.vmem [shape: bf16[2,4], index: 1, kind: input, shape index: {}]   ;;  %s839_s5 = inlined_call_operand.vmem [shape: f32[1,256], index: 5, kind: input, shape index: {}]   ;;  %s840_s4 = inlined_call_operand.vmem [shape: f32[4,1], index: 4, kind: input, shape index: {}]   ;;  %s841_s3 = inlined_call_operand.vmem [shape: bf16[9,4,2], index: 3, kind: input, shape index: {}]   ;;  %s842_s6 = inlined_call_operand.vmem [shape: bf16[4,256], index: 6, kind: output, shape index: {}, may-alias: {0,6}]  }
   0x1   :  { %v24_v0 = vld [vmem:[%s836_s0] sm:$0xf]  ;;  %607 = vset.pattern.permute.xlu0 %v664_v1  ;;  %s668_s28 = smov 119   ;;  %s669_s29 = smov 11   ;;  %vm124_vm5 = vcmask 1040384   ;;  %vm120_vm6 = vcmask 15360  }
   0x2   :  { %v27_v2 = vld [vmem:[%s837_s2] sm:$0x3]  ;;  %34 = vst [vmem:[#allocation1] ss:$4 sm:$0xff] %v24_v0  ;;  %v547_v3 = vunpack.c.l.bf16 %v24_v0  ;;  %s670_s30 = smov 127   ;;  %s671_s9 = smov 118  }
   0x3   :  { %30 = vperm.xlu0 %607, %v27_v2   ;;  %v26_v8 = vld [vmem:[%s838_s1] sm:$0x1]  ;;  %s672_s10 = smov 117   ;;  %v739_v42 = vand.u32 127, %v101_v41 }
   0x4   :  { %v722_v28 = vld [vmem:[%s839_s5] sm:$0x3]  ;;  %s665_s5 = smov 1  }
   0x5   :  { %v91_v30 = vperm.slane %v722_v28, 0  ;;  %v92_v33 = vperm.slane %v722_v28, 1  ;;  %v521_v40 = vld [vmem:[%s840_s4] sm:$0xf]  ;;  %vm196_vm2 = vcmp.lt.s32.totalorder %v739_v42, 9  ;;  %vm113_vm3 = vcmp.lt.s32.totalorder %v739_v42, 10 }
   0x6   :  { %vm244_vm4 = vcmp.lt.s32.totalorder %v739_v42, 1  ;;  %vm103_vm7 = vcmp.lt.s32.totalorder %v739_v42, 11  ;;  %vm333_vm8 = vcmp.lt.s32.totalorder %v739_v42, 127  ;;  %vm381_vm9 = vcmp.lt.s32.totalorder %v739_v42, 119 }
   0x7   :  { %vm429_vm10 = vcmp.lt.s32.totalorder %v739_v42, 118  ;;  %vm477_vm11 = vcmp.lt.s32.totalorder %v739_v42, 117 }
   0x9   :  { %v35_v4 = vld.sshfl [vmem:[#allocation1] sm:$0xff pattern:$0x73625140]  ;;  %v36_v5 = vld.sshfl [vmem:[#allocation1 + $0x8] sm:$0xff pattern:$0x73625140] }
   0xa   :  { %v42_v6 = vsel %vm41_vm0, %v35_v4, 0  ;;  %v44_v7 = vsel %vm41_vm0, %v36_v5, 0  ;;  %549 = vst [vmem:[#allocation1] ss:$2 sm:$0xff] %v547_v3  ;;  %v572_v4 = vld [vmem:[%s841_s3 + $0x2] sm:$0x3] }
   0xb   :  { %53 = vmatpush.bf16.msra.mxu0 %v42_v6  ;;  %66 = vmatpush.bf16.msra.mxu1 %v44_v7 }
   0xe   :  { %570 = vmatmul.msk.bf16.vlgmr.msra.gmra.mxu0 %vm37_vm1, %v26_v8  ;;  %571 = vmatmul.msk.bf16.vlgmr.msra.gmra.mxu1 %vm37_vm1, %v26_v8 }
  0x75   :  { %v31_v9 = vpop.permute.xlu0 %30 }
  0x8b   :  { %v55_v10 = vpop.f32.mrf.mxu0  ;;  %v68_v11 = vpop.f32.mrf.mxu1 }
  0x8c   :  { %v56_v12 = vadd.f32 %v55_v10, %v31_v9  ;;  %v69_v13 = vadd.f32 %v68_v11, %v31_v9 }
  0x8e   :  { %v72_v14 = vmin.f32 %v56_v12, 20.0  ;;  %v73_v15 = vmin.f32 %v69_v13, 20.0 }
  0x90   :  { %v74_v16 = vmul.f32 1.442695, %v72_v14  ;;  %v76_v17 = vmul.f32 1.442695, %v73_v15 }
  0x92   :  { %648 = vpow2.f32 %v74_v16 }
  0x93   :  { %650 = vpow2.f32 %v76_v17  ;;  %v57_v18 = vpop.f32.mrf.mxu0  ;;  %v70_v19 = vpop.f32.mrf.mxu1 }
  0x98   :  { %v649_v20 = vpop.eup %648 }
  0x99   :  { %v651_v21 = vpop.eup %650  ;;  %v78_v22 = vadd.f32 2.0, %v649_v20 }
  0x9a   :  { %v79_v23 = vadd.f32 2.0, %v651_v21 }
  0x9b   :  { %v80_v24 = vmul.f32 %v649_v20, %v78_v22 }
  0x9c   :  { %v81_v25 = vmul.f32 %v651_v21, %v79_v23 }
  0x9d   :  { %v84_v26 = vadd.f32 2.0, %v80_v24  ;;  %v82_v29 = vmul.f32 %v80_v24, %v56_v12 }
  0x9e   :  { %v85_v27 = vadd.f32 2.0, %v81_v25  ;;  %v83_v32 = vmul.f32 %v81_v25, %v69_v13 }
  0x9f   :  { %652 = vrcp.f32 %v84_v26 }
  0xa0   :  { %654 = vrcp.f32 %v85_v27 }
  0xa5   :  { %v653_v31 = vpop.eup %652 }
  0xa6   :  { %v655_v34 = vpop.eup %654  ;;  %v88_v35 = vmul.f32 %v653_v31, %v82_v29  ;;  %v106_v29 = vld [vmem:[%s841_s3] sm:$0x3] }
  0xa7   :  { %v89_v36 = vmul.f32 %v655_v34, %v83_v32 }
  0xa8   :  { %v728_v37 = vmul.f32 %v91_v30, %v88_v35 }
  0xa9   :  { %v732_v38 = vmul.f32 %v92_v33, %v89_v36 }
  0xaa   :  { %v290_v62 = vpack.c.bf16 %v728_v37, %v728_v37 }
  0xab   :  { %v623_v39 = vpack.i.bf16 %v732_v38, %v728_v37  ;;  %v291_v1 = vpack.c.bf16 %v732_v38, %v732_v38 }
  0xac   :  { %v296_v12 = vsel %vm124_vm5, %v290_v62, 0 }
  0xad   :  { %624 = vrot.lane.b32.xlu2 %v623_v39, %s665_s5  ;;  %614 = vrot.lane.b32.xlu1 %v623_v39, %s666_s26  ;;  %v299_v14 = vsel %vm124_vm5, %v291_v1, 0  ;;  %v592_v1 = vld [vmem:[%s841_s3 + $0xe] sm:$0x3] }
  0xae   :  { %609 = vrot.lane.b32.xlu0 %v623_v39, %s667_s27 }
  0xb5   :  { %629 = vrot.lane.b32.xlu2 %v623_v39, %s668_s28  ;;  %619 = vrot.lane.b32.xlu1 %v623_v39, %s669_s29 }
  0xb6   :  { %634 = vrot.lane.b32.xlu0 %v623_v39, %s670_s30 }
  0xbd   :  { %644 = vrot.lane.b32.xlu2 %v623_v39, %s671_s9  ;;  %639 = vrot.lane.b32.xlu1 %v623_v39, %s672_s10 }
  0xbe   :  { %524 = vperm.xlu0 %607, %v521_v40  }
 0x107   :  { %v625_v43 = vpop.permute.xlu2 %624 }
 0x108   :  { %v627_v50 = vunpack.i.h.bf16 %v625_v43  ;;  %v626_v51 = vunpack.i.l.bf16 %v625_v43 }
 0x10a   :  { %v246_v2 = vsel %vm244_vm4, %v627_v50, %v626_v51  ;;  %v245_v5 = vsel %vm244_vm4, %v626_v51, %v627_v50 }
 0x10b   :  { %v249_v13 = vpack.c.bf16 %v246_v2, %v246_v2  ;;  %v250_v17 = vpack.c.bf16 %v245_v5, %v245_v5  ;;  %v595_v2 = vld [vmem:[%s841_s3 + $0x10] sm:$0x3] }
 0x10d   :  { %v255_v26 = vsel %vm124_vm5, %v249_v13, 0  ;;  %v258_v27 = vsel %vm124_vm5, %v250_v17, 0 }
 0x10f   :  { %v630_v9 = vpop.permute.xlu2 %629 }
 0x110   :  { %v632_v31 = vunpack.i.h.bf16 %v630_v9  ;;  %v631_v32 = vunpack.i.l.bf16 %v630_v9 }
 0x112   :  { %v382_v37 = vsel %vm381_vm9, %v631_v32, %v632_v31  ;;  %v383_v38 = vsel %vm381_vm9, %v632_v31, %v631_v32 }
 0x113   :  { %v386_v41 = vpack.c.bf16 %v382_v37, %v382_v37  ;;  %v387_v43 = vpack.c.bf16 %v383_v38, %v383_v38 }
 0x117   :  { %v645_v36 = vpop.permute.xlu2 %644 }
 0x118   :  { %v647_v39 = vunpack.i.h.bf16 %v645_v36  ;;  %v646_v40 = vunpack.i.l.bf16 %v645_v36 }
 0x11f   :  { %v615_v44 = vpop.permute.xlu1 %614 }
 0x120   :  { %v617_v45 = vunpack.i.h.bf16 %v615_v44  ;;  %v616_v46 = vunpack.i.l.bf16 %v615_v44  ;;  %v610_v47 = vpop.permute.xlu0 %609  ;;  %v577_v44 = vld [vmem:[%s841_s3 + $0x4] sm:$0x3] }
 0x121   :  { %v612_v48 = vunpack.i.h.bf16 %v610_v47  ;;  %v611_v49 = vunpack.i.l.bf16 %v610_v47  ;;  %v392_v47 = vsel %vm124_vm5, %v386_v41, 0 }
 0x122   :  { %v198_v52 = vsel %vm196_vm2, %v617_v45, %v616_v46  ;;  %v197_v53 = vsel %vm196_vm2, %v616_v46, %v617_v45  ;;  %v430_v45 = vsel %vm429_vm10, %v646_v40, %v647_v39  ;;  %v431_v46 = vsel %vm429_vm10, %v647_v39, %v646_v40 }
 0x123   :  { %v115_v54 = vsel %vm113_vm3, %v612_v48, %v611_v49  ;;  %v114_v55 = vsel %vm113_vm3, %v611_v49, %v612_v48  ;;  %v201_v56 = vpack.c.bf16 %v198_v52, %v198_v52  ;;  %v202_v57 = vpack.c.bf16 %v197_v53, %v197_v53  ;;  %v580_v52 = vld [vmem:[%s841_s3 + $0x6] sm:$0x3] }
 0x124   :  { %v118_v58 = vpack.c.bf16 %v115_v54, %v115_v54  ;;  %v119_v59 = vpack.c.bf16 %v114_v55, %v114_v55  ;;  %v395_v48 = vsel %vm124_vm5, %v387_v43, 0  ;;  %v434_v50 = vpack.c.bf16 %v430_v45, %v430_v45 }
 0x125   :  { %v207_v60 = vsel %vm124_vm5, %v201_v56, 0  ;;  %v210_v61 = vsel %vm124_vm5, %v202_v57, 0  ;;  %v435_v51 = vpack.c.bf16 %v431_v46, %v431_v46 }
 0x126   :  { %v126_v63 = vsel %vm124_vm5, %v118_v58, 0  ;;  %v129_v0 = vsel %vm124_vm5, %v119_v59, 0  ;;  %v440_v55 = vsel %vm124_vm5, %v434_v50, 0 }
 0x127   :  { %138 = vmatpush.bf16.msra.mxu2 %v126_v63  ;;  %151 = vmatpush.bf16.msra.mxu3 %v129_v0  ;;  %v620_v3 = vpop.permute.xlu1 %619  ;;  %v443_v56 = vsel %vm124_vm5, %v435_v51, 0  ;;  %v586_v63 = vld [vmem:[%s841_s3 + $0xa] sm:$0x3]  ;;  %v589_v0 = vld [vmem:[%s841_s3 + $0xc] sm:$0x3] }
 0x128   :  { %v622_v6 = vunpack.i.h.bf16 %v620_v3  ;;  %v621_v7 = vunpack.i.l.bf16 %v620_v3  ;;  %v635_v8 = vpop.permute.xlu0 %634 }
 0x129   :  { %v637_v10 = vunpack.i.h.bf16 %v635_v8  ;;  %v636_v11 = vunpack.i.l.bf16 %v635_v8 }
 0x12a   :  { %573 = vmatmul.msk.bf16.vlgmr.msra.gmra.mxu2 %vm120_vm6, %v572_v4  ;;  %574 = vmatmul.msk.bf16.vlgmr.msra.gmra.mxu3 %vm120_vm6, %v572_v4  ;;  %v105_v15 = vsel %vm103_vm7, %v622_v6, %v621_v7  ;;  %v104_v16 = vsel %vm103_vm7, %v621_v7, %v622_v6 }
 0x12b   :  { %219 = vmatpush.bf16.msrb.mxu2 %v207_v60  ;;  %232 = vmatpush.bf16.msrb.mxu3 %v210_v61  ;;  %v107_v18 = vpack.c.bf16 %v105_v15, %v105_v15  ;;  %v108_v19 = vpack.c.bf16 %v104_v16, %v104_v16  ;;  %v334_v20 = vsel %vm333_vm8, %v636_v11, %v637_v10  ;;  %v583_v61 = vld [vmem:[%s841_s3 + $0x8] sm:$0x3] }
 0x12c   :  { %v335_v21 = vsel %vm333_vm8, %v637_v10, %v636_v11  ;;  %v338_v24 = vpack.c.bf16 %v334_v20, %v334_v20 }
 0x12d   :  { %v161_v22 = vsel %vm124_vm5, %v107_v18, 0  ;;  %v164_v23 = vsel %vm124_vm5, %v108_v19, 0  ;;  %v339_v25 = vpack.c.bf16 %v335_v21, %v335_v21 }
 0x12e   :  { %173 = vmatpush.bf16.msrb.mxu0 %v161_v22  ;;  %186 = vmatpush.bf16.msrb.mxu1 %v164_v23  ;;  %v344_v34 = vsel %vm124_vm5, %v338_v24, 0 }
 0x12f   :  { %308 = vmatpush.bf16.msra.mxu2 %v296_v12  ;;  %321 = vmatpush.bf16.msra.mxu3 %v299_v14  ;;  %v347_v35 = vsel %vm124_vm5, %v339_v25, 0  ;;  %v640_v49 = vpop.permute.xlu1 %639 }
 0x130   :  { %v642_v53 = vunpack.i.h.bf16 %v640_v49  ;;  %v641_v54 = vunpack.i.l.bf16 %v640_v49 }
 0x131   :  { %575 = vmatmul.msk.bf16.vlgmr.msrb.gmra.mxu0 %vm120_vm6, %v106_v29  ;;  %576 = vmatmul.msk.bf16.vlgmr.msrb.gmra.mxu1 %vm120_vm6, %v106_v29 }
 0x132   :  { %267 = vmatpush.bf16.msra.mxu0 %v255_v26  ;;  %280 = vmatpush.bf16.msra.mxu1 %v258_v27  ;;  %v478_v57 = vsel %vm477_vm11, %v641_v54, %v642_v53  ;;  %v479_v58 = vsel %vm477_vm11, %v642_v53, %v641_v54 }
 0x133   :  { %v482_v59 = vpack.c.bf16 %v478_v57, %v478_v57  ;;  %v483_v60 = vpack.c.bf16 %v479_v58, %v479_v58  ;;  %v525_v57 = vpop.permute.xlu0 %524 }
 0x135   :  { %v488_v42 = vsel %vm124_vm5, %v482_v59, 0  ;;  %v491_v62 = vsel %vm124_vm5, %v483_v60, 0 }
 0x136   :  { %356 = vmatpush.bf16.msrb.mxu0 %v344_v34  ;;  %369 = vmatpush.bf16.msrb.mxu1 %v347_v35 }
 0x13a   :  { %578 = vmatmul.msk.bf16.vlgmr.msrb.gmra.mxu2 %vm120_vm6, %v577_v44  ;;  %579 = vmatmul.msk.bf16.vlgmr.msrb.gmra.mxu3 %vm120_vm6, %v577_v44 }
 0x13b   :  { %404 = vmatpush.bf16.msrb.mxu2 %v392_v47  ;;  %417 = vmatpush.bf16.msrb.mxu3 %v395_v48 }
 0x141   :  { %581 = vmatmul.msk.bf16.vlgmr.msra.gmra.mxu0 %vm120_vm6, %v580_v52  ;;  %582 = vmatmul.msk.bf16.vlgmr.msra.gmra.mxu1 %vm120_vm6, %v580_v52 }
 0x142   :  { %452 = vmatpush.bf16.msra.mxu0 %v440_v55  ;;  %465 = vmatpush.bf16.msra.mxu1 %v443_v56 }
 0x14a   :  { %584 = vmatmul.msk.bf16.vlgmr.msra.gmra.mxu2 %vm120_vm6, %v583_v61  ;;  %585 = vmatmul.msk.bf16.vlgmr.msra.gmra.mxu3 %vm120_vm6, %v583_v61 }
 0x14b   :  { %500 = vmatpush.bf16.msra.mxu2 %v488_v42  ;;  %513 = vmatpush.bf16.msra.mxu3 %v491_v62 }
 0x151   :  { %587 = vmatmul.msk.bf16.vlgmr.msrb.gmra.mxu0 %vm120_vm6, %v586_v63  ;;  %588 = vmatmul.msk.bf16.vlgmr.msrb.gmra.mxu1 %vm120_vm6, %v586_v63 }
 0x15a   :  { %590 = vmatmul.msk.bf16.vlgmr.msrb.gmra.mxu2 %vm120_vm6, %v589_v0  ;;  %591 = vmatmul.msk.bf16.vlgmr.msrb.gmra.mxu3 %vm120_vm6, %v589_v0 }
 0x161   :  { %593 = vmatmul.msk.bf16.vlgmr.msra.gmra.mxu0 %vm120_vm6, %v592_v1  ;;  %594 = vmatmul.msk.bf16.vlgmr.msra.gmra.mxu1 %vm120_vm6, %v592_v1 }
 0x16a   :  { %596 = vmatmul.msk.bf16.vlgmr.msra.gmra.mxu2 %vm120_vm6, %v595_v2  ;;  %597 = vmatmul.msk.bf16.vlgmr.msra.gmra.mxu3 %vm120_vm6, %v595_v2 }
 0x1ad   :  { %v140_v3 = vpop.f32.mrf.mxu2  ;;  %v153_v4 = vpop.f32.mrf.mxu3 }
 0x1ae   :  { %v175_v5 = vpop.f32.mrf.mxu0  ;;  %v188_v6 = vpop.f32.mrf.mxu1 }
 0x1af   :  { %v176_v27 = vadd.f32 %v175_v5, %v140_v3  ;;  %v189_v29 = vadd.f32 %v188_v6, %v153_v4 }
 0x1b5   :  { %v142_v7 = vpop.f32.mrf.mxu2  ;;  %v155_v8 = vpop.f32.mrf.mxu3 }
 0x1b6   :  { %v177_v9 = vpop.f32.mrf.mxu0  ;;  %v190_v10 = vpop.f32.mrf.mxu1 }
 0x1bd   :  { %v221_v11 = vpop.f32.mrf.mxu2  ;;  %v234_v12 = vpop.f32.mrf.mxu3 }
 0x1be   :  { %v269_v13 = vpop.f32.mrf.mxu0  ;;  %v282_v14 = vpop.f32.mrf.mxu1  ;;  %v238_v31 = vadd.f32 %v221_v11, %v176_v27  ;;  %v239_v32 = vadd.f32 %v234_v12, %v189_v29  ;;  %v550_v11 = vld.sshfl [vmem:[#allocation1] sm:$0xff pattern:$0x75316420] }
 0x1c0   :  { %v286_v38 = vadd.f32 %v269_v13, %v238_v31  ;;  %v287_v39 = vadd.f32 %v282_v14, %v239_v32 }
 0x1c5   :  { %v223_v15 = vpop.f32.mrf.mxu2  ;;  %v236_v16 = vpop.f32.mrf.mxu3 }
 0x1c6   :  { %v271_v17 = vpop.f32.mrf.mxu0  ;;  %v284_v18 = vpop.f32.mrf.mxu1  ;;  %v551_v15 = vld.sshfl [vmem:[#allocation1 + $0x8] sm:$0xff pattern:$0x75316420] }
 0x1cd   :  { %v310_v19 = vpop.f32.mrf.mxu2  ;;  %v323_v20 = vpop.f32.mrf.mxu3 }
 0x1ce   :  { %v358_v21 = vpop.f32.mrf.mxu0  ;;  %v371_v22 = vpop.f32.mrf.mxu1  ;;  %v327_v40 = vadd.f32 %v310_v19, %v286_v38  ;;  %v328_v41 = vadd.f32 %v323_v20, %v287_v39 }
 0x1d0   :  { %v375_v45 = vadd.f32 %v358_v21, %v327_v40  ;;  %v376_v46 = vadd.f32 %v371_v22, %v328_v41 }
 0x1d5   :  { %v312_v23 = vpop.f32.mrf.mxu2  ;;  %v325_v24 = vpop.f32.mrf.mxu3 }
 0x1d6   :  { %v360_v25 = vpop.f32.mrf.mxu0  ;;  %v373_v26 = vpop.f32.mrf.mxu1 }
 0x1dd   :  { %v406_v34 = vpop.f32.mrf.mxu2  ;;  %v419_v35 = vpop.f32.mrf.mxu3 }
 0x1de   :  { %v454_v36 = vpop.f32.mrf.mxu0  ;;  %v467_v37 = vpop.f32.mrf.mxu1  ;;  %v423_v49 = vadd.f32 %v406_v34, %v375_v45  ;;  %v424_v50 = vadd.f32 %v419_v35, %v376_v46 }
 0x1e0   :  { %v471_v51 = vadd.f32 %v454_v36, %v423_v49  ;;  %v472_v52 = vadd.f32 %v467_v37, %v424_v50 }
 0x1e5   :  { %v408_v43 = vpop.f32.mrf.mxu2  ;;  %v421_v44 = vpop.f32.mrf.mxu3 }
 0x1e6   :  { %v456_v47 = vpop.f32.mrf.mxu0  ;;  %v469_v48 = vpop.f32.mrf.mxu1 }
 0x1ed   :  { %v502_v53 = vpop.f32.mrf.mxu2  ;;  %v515_v54 = vpop.f32.mrf.mxu3 }
 0x1ee   :  { %v519_v55 = vadd.f32 %v502_v53, %v471_v51  ;;  %v520_v56 = vadd.f32 %v515_v54, %v472_v52 }
 0x1f0   :  { %v527_v58 = vadd.f32 %v525_v57, %v519_v55  ;;  %v528_v59 = vadd.f32 %v525_v57, %v520_v56 }
 0x1f2   :  { %v529_v60 = vmin.f32 %v527_v58, 20.0  ;;  %v530_v61 = vmin.f32 %v528_v59, 20.0 }
 0x1f4   :  { %v531_v42 = vmul.f32 1.442695, %v529_v60  ;;  %v533_v62 = vmul.f32 1.442695, %v530_v61 }
 0x1f5   :  { %v504_v63 = vpop.f32.mrf.mxu2  ;;  %v517_v0 = vpop.f32.mrf.mxu3 }
 0x1f6   :  { %656 = vpow2.f32 %v531_v42 }
 0x1f7   :  { %658 = vpow2.f32 %v533_v62 }
 0x1fc   :  { %v657_v1 = vpop.eup %656 }
 0x1fd   :  { %v659_v2 = vpop.eup %658  ;;  %v535_v3 = vadd.f32 2.0, %v657_v1 }
 0x1fe   :  { %v536_v4 = vadd.f32 2.0, %v659_v2 }
 0x1ff   :  { %v537_v5 = vmul.f32 %v657_v1, %v535_v3 }
 0x200   :  { %v538_v6 = vmul.f32 %v659_v2, %v536_v4 }
 0x201   :  { %v541_v7 = vadd.f32 2.0, %v537_v5  ;;  %v539_v9 = vmul.f32 %v537_v5, %v527_v58 }
 0x202   :  { %v542_v8 = vadd.f32 2.0, %v538_v6  ;;  %v540_v12 = vmul.f32 %v538_v6, %v528_v59 }
 0x203   :  { %660 = vrcp.f32 %v541_v7 }
 0x204   :  { %662 = vrcp.f32 %v542_v8 }
 0x209   :  { %v661_v10 = vpop.eup %660 }
 0x20a   :  { %v663_v13 = vpop.eup %662  ;;  %v545_v14 = vmul.f32 %v661_v10, %v539_v9 }
 0x20b   :  { %v546_v16 = vmul.f32 %v663_v13, %v540_v12 }
 0x20c   :  { %v554_v17 = vadd.f32 %v550_v11, %v545_v14 }
 0x20d   :  { %v555_v18 = vadd.f32 %v551_v15, %v546_v16 }
 0x20e   :  { %v556_v19 = vmul.f32 %v554_v17, %v91_v30 }
 0x20f   :  { %v557_v20 = vmul.f32 %v555_v18, %v92_v33 }
 0x211   :  { %v558_v21 = vpack.c.bf16 %v557_v20, %v556_v19 }
 0x213   :  { %v560_v22 = vrot.slane %v558_v21, 2 }
 0x215   :  { %v563_v23 = vsel %vm41_vm0, %v558_v21, %v560_v22 }
 0x216   :  { %565 = vst [vmem:[%s842_s6] sm:$0xf] %v563_v23 }

</bundles_post_ra>
